<compile_context>
chip_gen: v5e
topology: v5e:2x2
jax: 0.10.0
libtpu: 0.0.40
codegen_flags: <defaults>
</compile_context>

<pallas_src>
import functools

import jax
import jax.numpy as jnp
from jax.experimental import pallas as pl
from jax.experimental.pallas import tpu as pltpu


def kvmemnn_kernel(ep_ref, lab_ref, wk_ref, wv_ref, bk_ref, bv_ref,
                   o_ref, lab_sum_ref, *, inv_l):
    """One (tile_b, tile_l) grid step.

    The trailing grid axis (L) is a reduction: partial sums of labels_ are
    accumulated into lab_sum_ref; matmuls / normalization / residual run once
    per B tile on the last L step (output block is resident across L).
    """
    l_idx = pl.program_id(1)

    @pl.when(l_idx == 0)
    def _init():
        lab_sum_ref[...] = jnp.zeros_like(lab_sum_ref)

    # Partial sum over this slab of labels_ (mean = sum * (1/L), applied below).
    lab_sum_ref[...] += jnp.sum(lab_ref[...], axis=1)

    @pl.when(l_idx == pl.num_programs(1) - 1)
    def _finalize():
        ep = ep_ref[...]                                   # (TB, H)  f32
        labels_mean = lab_sum_ref[...] * inv_l             # (TB, H)  f32

        # v = value(cat([entity_pair, labels_mean], -1))  -- single fused
        # K=2H matmul on the MXU, bf16 operands, f32 accumulation.
        v_in = jnp.concatenate([ep, labels_mean], axis=-1).astype(jnp.bfloat16)
        v = jnp.dot(v_in, wv_ref[...],
                    preferred_element_type=jnp.float32) + bv_ref[...]

        # u = key(entity_pair)
        u = jnp.dot(ep.astype(jnp.bfloat16), wk_ref[...],
                    preferred_element_type=jnp.float32) + bk_ref[...]

        # p = exp(u) / (sum(exp(u), 1) + 1e-10)  (divide on the EUP slot).
        exp_u = jnp.exp(u)
        sum_exp_u = jnp.sum(exp_u, axis=1, keepdims=True)  # (TB, 1)
        p = exp_u * pl.reciprocal(sum_exp_u + 1e-10, approx=True)

        # o = p * v + entity_pair
        o_ref[...] = p * v + ep


def prepare_params(w_key, b_key, w_value, b_value, matmul_dtype=jnp.bfloat16):
    """One-time parameter prep (hoisted out of the per-step forward).

    PyTorch Linear weights are (out, in); transpose to (in, out) so the kernel
    does y = x @ W + b (identical math), and cast matmul weights to bf16."""
    H = w_key.shape[0]
    wk = jnp.transpose(w_key).astype(matmul_dtype)          # (H, H)
    wv = jnp.transpose(w_value).astype(matmul_dtype)        # (2H, H)
    bk = jnp.asarray(b_key, jnp.float32).reshape(1, H)
    bv = jnp.asarray(b_value, jnp.float32).reshape(1, H)
    return wk, wv, bk, bv


def _vmem_budget_bytes():
    """Per-generation VMEM budget used for vmem_limit_bytes and tile sizing."""
    try:
        kind = jax.devices()[0].device_kind.lower()
    except Exception:
        kind = ""
    if "v7" in kind:
        return 48 << 20      # v7x: 64 MiB physical per TC -> leave headroom
    if "v6" in kind:
        return 64 << 20      # v6e: 128 MiB physical, raise above 32 MiB default
    if "v5" in kind:
        return 32 << 20      # v5e: scoped default is only 16 MiB; raise it
    return 32 << 20          # conservative default, fits every generation


def _auto_tile_b(B, tile_l, H, budget_bytes, weight_bytes):
    """Largest multiple-of-8 batch tile (dividing B) whose double-buffered
    footprint fits comfortably inside the VMEM budget."""
    if B % 8 != 0:
        return B  # TODO(synk): ragged / tiny batch -> single whole-B tile.
    per_row = 4 * H * (2 + 2 + 1) + 4 * tile_l * H * 2   # ep+out (x2 bufs) + scratch + labels slab (x2 bufs)
    fixed = 2 * weight_bytes + 4 * 2 * H * 2              # weights + biases (x2 bufs)
    avail = max(budget_bytes // 2 - fixed, 8 * per_row)
    tb = min(B, 2048, max(8, (avail // per_row) // 8 * 8))
    while B % tb != 0 and tb > 8:
        tb -= 8
    return tb


def kvmemnn_forward(entity_pair, labels_, params, *, tile_b=None, tile_l=None):
    """entity_pair: (B, H); labels_: (B, L, H); params from prepare_params."""
    wk, wv, bk, bv = params
    B, H = entity_pair.shape
    _, L, _ = labels_.shape

    if tile_l is None:
        # Full-L slab per tile by default; pass a smaller multiple of 8 for
        # very large L so only a (tile_b, tile_l, H) slab is VMEM-resident.
        tile_l = L
    if tile_b is None:
        weight_bytes = (wk.size * wk.dtype.itemsize
                        + wv.size * wv.dtype.itemsize)
        tile_b = _auto_tile_b(B, tile_l, H, _vmem_budget_bytes(), weight_bytes)

    assert B % tile_b == 0 and (tile_b % 8 == 0 or tile_b == B), (B, tile_b)
    assert L % tile_l == 0 and (tile_l % 8 == 0 or tile_l == L), (L, tile_l)

    ep = entity_pair.astype(jnp.float32)
    lab = labels_.astype(jnp.float32)
    grid = (B // tile_b, L // tile_l)
    kernel = functools.partial(kvmemnn_kernel, inv_l=1.0 / L)

    return pl.pallas_call(
        kernel,
        out_shape=jax.ShapeDtypeStruct((B, H), jnp.float32),
        grid_spec=pltpu.PrefetchScalarGridSpec(
            num_scalar_prefetch=0,
            grid=grid,
            in_specs=[
                pl.BlockSpec((tile_b, H), lambda i, l: (i, 0)),             # entity_pair
                pl.BlockSpec((tile_b, tile_l, H), lambda i, l: (i, l, 0)),  # labels_
                pl.BlockSpec((H, H), lambda i, l: (0, 0)),                  # key W^T (bf16)
                pl.BlockSpec((2 * H, H), lambda i, l: (0, 0)),              # value W^T (bf16)
                pl.BlockSpec((1, H), lambda i, l: (0, 0)),                  # key bias
                pl.BlockSpec((1, H), lambda i, l: (0, 0)),                  # value bias
            ],
            out_specs=pl.BlockSpec((tile_b, H), lambda i, l: (i, 0)),
            scratch_shapes=[pltpu.VMEM((tile_b, H), jnp.float32)],
        ),
        compiler_params=pltpu.CompilerParams(
            dimension_semantics=("parallel", "arbitrary"),
            vmem_limit_bytes=_vmem_budget_bytes(),
        ),
    )(ep, lab, wk, wv, bk, bv)


def kvmemnn_ref(entity_pair, labels_, w_key, b_key, w_value, b_value):
    """Pure-JAX reference mirroring the PyTorch forward exactly (f32)."""
    B, H = entity_pair.shape
    labels_output = jnp.mean(labels_, axis=1).reshape(B, -1)
    v_in = jnp.concatenate([entity_pair, labels_output], axis=-1)
    v = v_in @ w_value.T + b_value
    u = entity_pair @ w_key.T + b_key
    exp_u = jnp.exp(u)
    sum_exp_u = jnp.broadcast_to(jnp.sum(exp_u, axis=1, keepdims=True),
                                 exp_u.shape)
    p = exp_u / (sum_exp_u + 1e-10)
    return p * v + entity_pair


if __name__ == "__main__":
    # Small but (8,128)-aligned demo shapes: lane-dense output (H multiple of
    # 128), sublane-full batch tiles, 2x2 grid to exercise both the pipelined
    # B axis and the L reduction axis.
    B, L, H = 16, 16, 128

    key = jax.random.PRNGKey(0)
    k_ep, k_lab, k_wk, k_bk, k_wv, k_bv = jax.random.split(key, 6)

    entity_pair = jax.random.normal(k_ep, (B, H), dtype=jnp.float32)
    labels_ = jax.random.normal(k_lab, (B, L, H), dtype=jnp.float32)

    # PyTorch Linear layout: weight is (out, in).
    w_key_p = jax.random.normal(k_wk, (H, H), dtype=jnp.float32) * 0.05
    b_key_p = jax.random.normal(k_bk, (H,), dtype=jnp.float32) * 0.05
    w_value_p = jax.random.normal(k_wv, (H, 2 * H), dtype=jnp.float32) * 0.05
    b_value_p = jax.random.normal(k_bv, (H,), dtype=jnp.float32) * 0.05

    params = prepare_params(w_key_p, b_key_p, w_value_p, b_value_p)

    out = kvmemnn_forward(entity_pair, labels_, params, tile_b=8, tile_l=8)
    out = jax.block_until_ready(out)

    ref = kvmemnn_ref(entity_pair, labels_, w_key_p, b_key_p,
                      w_value_p, b_value_p)
    assert out.shape == (B, H) and out.dtype == jnp.float32
    # bf16 matmul operands + approx reciprocal -> loosen the bitwise-f32
    # tolerance slightly (residual path and accumulation remain f32).
    assert jnp.allclose(out, ref, atol=2e-2, rtol=2e-2), "mismatch vs reference"

    print("KERNEL_OK")
</pallas_src>

<mosaic_0001>
module attributes {stable_mosaic.version = 11 : i64} {
  func.func @kvmemnn_kernel(%arg0: i32, %arg1: i32, %arg2: memref<8x128xf32, #tpu.memory_space<vmem>>, %arg3: memref<8x8x128xf32, #tpu.memory_space<vmem>>, %arg4: memref<128x128xbf16, #tpu.memory_space<vmem>>, %arg5: memref<256x128xbf16, #tpu.memory_space<vmem>>, %arg6: memref<1x128xf32, #tpu.memory_space<vmem>>, %arg7: memref<1x128xf32, #tpu.memory_space<vmem>>, %arg8: memref<8x128xf32, #tpu.memory_space<vmem>>, %arg9: memref<8x128xf32, #tpu.memory_space<vmem>>) attributes {dimension_semantics = [#tpu.dimension_semantics<parallel>, #tpu.dimension_semantics<arbitrary>], iteration_bounds = array<i64: 2, 2>, scalar_prefetch = 0 : i64, scratch_operands = 1 : i64, tpu.core_type = #tpu.core_type<tc>, window_params = [{transform_indices = @transform_0, window_bounds = array<i64: 8, 128>}, {transform_indices = @transform_1, window_bounds = array<i64: 8, 8, 128>}, {pipeline_mode = #tpu.pipeline_mode<synchronous>, transform_indices = @transform_2, window_bounds = array<i64: 128, 128>}, {pipeline_mode = #tpu.pipeline_mode<synchronous>, transform_indices = @transform_3, window_bounds = array<i64: 256, 128>}, {pipeline_mode = #tpu.pipeline_mode<synchronous>, transform_indices = @transform_4, window_bounds = array<i64: 1, 128>}, {pipeline_mode = #tpu.pipeline_mode<synchronous>, transform_indices = @transform_5, window_bounds = array<i64: 1, 128>}, {transform_indices = @transform_6, window_bounds = array<i64: 8, 128>}]} {
    %c0_i32 = arith.constant 0 : i32
    %0 = arith.cmpi eq, %arg1, %c0_i32 : i32
    %1 = arith.extui %0 : i1 to i32
    %c0_i32_0 = arith.constant 0 : i32
    %2 = arith.cmpi ne, %1, %c0_i32_0 : i32
    scf.if %2 {
      %cst_8 = arith.constant 0.000000e+00 : f32
      %11 = vector.broadcast %cst_8 : f32 to vector<8x128xf32>
      %c0_9 = arith.constant 0 : index
      %c0_10 = arith.constant 0 : index
      %12 = vector.load %arg9[%c0_9, %c0_10] : memref<8x128xf32, #tpu.memory_space<vmem>>, vector<8x128xf32>
      tpu.vector_store %arg9[%c0_9, %c0_10], %11 {strides = array<i32>} : memref<8x128xf32, #tpu.memory_space<vmem>>, vector<8x128xf32>,
    } else {
    }
    %c0 = arith.constant 0 : index
    %c0_1 = arith.constant 0 : index
    %3 = vector.load %arg9[%c0, %c0_1] : memref<8x128xf32, #tpu.memory_space<vmem>>, vector<8x128xf32>
    %c0_2 = arith.constant 0 : index
    %c0_3 = arith.constant 0 : index
    %c0_4 = arith.constant 0 : index
    %4 = vector.load %arg3[%c0_2, %c0_3, %c0_4] : memref<8x8x128xf32, #tpu.memory_space<vmem>>, vector<8x8x128xf32>
    %cst = arith.constant dense<0.000000e+00> : vector<8x128xf32>
    %5 = vector.multi_reduction <add>, %4, %cst [1] : vector<8x8x128xf32> to vector<8x128xf32>
    %6 = arith.addf %3, %5 : vector<8x128xf32>
    %c0_5 = arith.constant 0 : index
    %c0_6 = arith.constant 0 : index
    %7 = vector.load %arg9[%c0_5, %c0_6] : memref<8x128xf32, #tpu.memory_space<vmem>>, vector<8x128xf32>
    tpu.vector_store %arg9[%c0_5, %c0_6], %6 {strides = array<i32>} : memref<8x128xf32, #tpu.memory_space<vmem>>, vector<8x128xf32>,
    %c1_i32 = arith.constant 1 : i32
    %8 = arith.cmpi eq, %arg1, %c1_i32 : i32
    %9 = arith.extui %8 : i1 to i32
    %c0_i32_7 = arith.constant 0 : i32
    %10 = arith.cmpi ne, %9, %c0_i32_7 : i32
    scf.if %10 {
      %c0_8 = arith.constant 0 : index
      %c0_9 = arith.constant 0 : index
      %11 = vector.load %arg2[%c0_8, %c0_9] : memref<8x128xf32, #tpu.memory_space<vmem>>, vector<8x128xf32>
      %c0_10 = arith.constant 0 : index
      %c0_11 = arith.constant 0 : index
      %12 = vector.load %arg9[%c0_10, %c0_11] : memref<8x128xf32, #tpu.memory_space<vmem>>, vector<8x128xf32>
      %cst_12 = arith.constant 6.250000e-02 : f32
      %13 = vector.broadcast %cst_12 : f32 to vector<8x128xf32>
      %14 = arith.mulf %12, %13 : vector<8x128xf32>
      %15 = tpu.concatenate %11, %14 in 1 : vector<8x128xf32>, vector<8x128xf32> -> vector<8x256xf32>
      %16 = arith.truncf %15 : vector<8x256xf32> to vector<8x256xbf16>
      %c0_13 = arith.constant 0 : index
      %c0_14 = arith.constant 0 : index
      %17 = vector.load %arg5[%c0_13, %c0_14] : memref<256x128xbf16, #tpu.memory_space<vmem>>, vector<256x128xbf16>
      %cst_15 = arith.constant dense<0.000000e+00> : vector<8x128xf32>
      %18 = tpu.matmul %16, %17, %cst_15 {dimension_numbers = #tpu.dot_dimension_numbers<[1], [0], [0], [1], [0, 0, 1, 1], [], []>} : vector<8x256xbf16>, vector<256x128xbf16>, vector<8x128xf32> -> vector<8x128xf32>
      %c0_16 = arith.constant 0 : index
      %c0_17 = arith.constant 0 : index
      %19 = vector.load %arg7[%c0_16, %c0_17] : memref<1x128xf32, #tpu.memory_space<vmem>>, vector<1x128xf32>
      %20 = vector.broadcast %19 : vector<1x128xf32> to vector<8x128xf32>
      %21 = arith.addf %18, %20 : vector<8x128xf32>
      %22 = arith.truncf %11 : vector<8x128xf32> to vector<8x128xbf16>
      %c0_18 = arith.constant 0 : index
      %c0_19 = arith.constant 0 : index
      %23 = vector.load %arg4[%c0_18, %c0_19] : memref<128x128xbf16, #tpu.memory_space<vmem>>, vector<128x128xbf16>
      %cst_20 = arith.constant dense<0.000000e+00> : vector<8x128xf32>
      %24 = tpu.matmul %22, %23, %cst_20 {dimension_numbers = #tpu.dot_dimension_numbers<[1], [0], [0], [1], [0, 0, 1, 1], [], []>} : vector<8x128xbf16>, vector<128x128xbf16>, vector<8x128xf32> -> vector<8x128xf32>
      %c0_21 = arith.constant 0 : index
      %c0_22 = arith.constant 0 : index
      %25 = vector.load %arg6[%c0_21, %c0_22] : memref<1x128xf32, #tpu.memory_space<vmem>>, vector<1x128xf32>
      %26 = vector.broadcast %25 : vector<1x128xf32> to vector<8x128xf32>
      %27 = arith.addf %24, %26 : vector<8x128xf32>
      %28 = math.exp %27 : vector<8x128xf32>
      %cst_23 = arith.constant dense<0.000000e+00> : vector<8xf32>
      %29 = vector.multi_reduction <add>, %28, %cst_23 [1] : vector<8x128xf32> to vector<8xf32>
      %30 = vector.shape_cast %29 : vector<8xf32> to vector<8x1xf32>
      %cst_24 = arith.constant 1.000000e-10 : f32
      %31 = vector.broadcast %cst_24 : f32 to vector<8x1xf32>
      %32 = arith.addf %30, %31 : vector<8x1xf32>
      %33 = tpu.reciprocal %32 {approx = true} : vector<8x1xf32> -> vector<8x1xf32>
      %34 = vector.broadcast %33 : vector<8x1xf32> to vector<8x128xf32>
      %35 = arith.mulf %28, %34 : vector<8x128xf32>
      %36 = arith.mulf %35, %21 : vector<8x128xf32>
      %37 = arith.addf %36, %11 : vector<8x128xf32>
      %c0_25 = arith.constant 0 : index
      %c0_26 = arith.constant 0 : index
      %38 = vector.load %arg8[%c0_25, %c0_26] : memref<8x128xf32, #tpu.memory_space<vmem>>, vector<8x128xf32>
      tpu.vector_store %arg8[%c0_25, %c0_26], %37 {strides = array<i32>} : memref<8x128xf32, #tpu.memory_space<vmem>>, vector<8x128xf32>,
    } else {
    }
    return
  }
  func.func @transform_0(%arg0: i32, %arg1: i32) -> (i32, i32) {
    %c0_i32 = arith.constant 0 : i32
    %c0_i32_0 = arith.constant 0 : i32
    return %arg0, %c0_i32 : i32, i32
  }
  func.func @transform_1(%arg0: i32, %arg1: i32) -> (i32, i32, i32) {
    %c0_i32 = arith.constant 0 : i32
    %c0_i32_0 = arith.constant 0 : i32
    return %arg0, %arg1, %c0_i32 : i32, i32, i32
  }
  func.func @transform_2(%arg0: i32, %arg1: i32) -> (i32, i32) {
    %c0_i32 = arith.constant 0 : i32
    %c0_i32_0 = arith.constant 0 : i32
    %c0_i32_1 = arith.constant 0 : i32
    return %c0_i32, %c0_i32_0 : i32, i32
  }
  func.func @transform_3(%arg0: i32, %arg1: i32) -> (i32, i32) {
    %c0_i32 = arith.constant 0 : i32
    %c0_i32_0 = arith.constant 0 : i32
    %c0_i32_1 = arith.constant 0 : i32
    return %c0_i32, %c0_i32_0 : i32, i32
  }
  func.func @transform_4(%arg0: i32, %arg1: i32) -> (i32, i32) {
    %c0_i32 = arith.constant 0 : i32
    %c0_i32_0 = arith.constant 0 : i32
    %c0_i32_1 = arith.constant 0 : i32
    return %c0_i32, %c0_i32_0 : i32, i32
  }
  func.func @transform_5(%arg0: i32, %arg1: i32) -> (i32, i32) {
    %c0_i32 = arith.constant 0 : i32
    %c0_i32_0 = arith.constant 0 : i32
    %c0_i32_1 = arith.constant 0 : i32
    return %c0_i32, %c0_i32_0 : i32, i32
  }
  func.func @transform_6(%arg0: i32, %arg1: i32) -> (i32, i32) {
    %c0_i32 = arith.constant 0 : i32
    %c0_i32_0 = arith.constant 0 : i32
    return %arg0, %c0_i32 : i32, i32
  }
}

</mosaic_0001>

<bundles_post_ra>
// kernel: tpu_custom_call.1
= control target key start
LH: loop header
LB: loop body
LE: loop exit
PB: predicated region body
PF: predicated region fallthrough
CT: control target
= control target key end

     0   :  { %s1702_s0 = inlined_call_operand.hbm [shape: f32[16,128], index: 0, kind: input, shape index: {}]   ;;  %s1703_s1 = inlined_call_operand.hbm [shape: f32[16,16,128], index: 1, kind: input, shape index: {}]   ;;  %s1704_s2 = inlined_call_operand.hbm [shape: bf16[128,128], index: 2, kind: input, shape index: {}]   ;;  %s1705_s3 = inlined_call_operand.hbm [shape: bf16[256,128], index: 3, kind: input, shape index: {}]   ;;  %s1706_s4 = inlined_call_operand.vmem [shape: f32[1,128], index: 4, kind: input, shape index: {}]   ;;  %s1707_s5 = inlined_call_operand.vmem [shape: f32[1,128], index: 5, kind: input, shape index: {}]   ;;  %s1708_s6 = inlined_call_operand.hbm [shape: f32[16,128], index: 6, kind: output, shape index: {}]  }
   0x1   :  { %1721 = sst [smem:[#allocation28_spill]] %s1702_s0 }
   0x2   :  { %1722 = sst [smem:[#allocation29_spill]] %s1704_s2 }
   0x3   :  { %1723 = sst [smem:[#allocation30_spill]] %s1705_s3 }
   0x4   :  { %1724 = sst [smem:[#allocation31_spill]] %s1706_s4 }
   0x5   :  { %1725 = sst [smem:[#allocation32_spill]] %s1707_s5 }
   0x6   :  { %1726 = sst [smem:[#allocation33_spill]] %s1708_s6 }
   0x7   :  { %11 = vsyncpa [#allocation4], 0 }
   0x8   :  { %13 = vsyncpa [#allocation4 + $0x1], 0 }
   0x9   :  { %14 = vsyncpa [#allocation7], 0 }
   0xa   :  { %16 = vsyncpa [#allocation7 + $0x1], 0 }
   0xb   :  { %17 = vsyncpa [#allocation10], 0 }
   0xc   :  { %18 = vsyncpa [#allocation5], 0 }
   0xd   :  { %20 = vsyncpa [#allocation5 + $0x1], 0  ;;  %s1431_s21 = smov 0   ;;  %s1433_s22 = smov 0  }
   0xe   :  { %s1435_s23 = smov 0   ;;  %s1437_s24 = smov 0  }
   0xf   :  { %s1439_s25 = smov 0   ;;  %s1441_s26 = smov 0  }
  0x10   :  { %s1443_s27 = smov 0   ;;  %s1445_s28 = smov 0  }
  0x11   :  { %s1447_s29 = smov 0   ;;  %s1449_s30 = smov 0  }
  0x12   :  { %s1451_s7 = smov 0  }
  0x13 LB: > { %1727 = sst [smem:[#allocation17_spill]] %s1358_s24  ;;  %s1487_s8 = sadd.s32 4294967295, %s1386_s7   ;;  %s1386_s7 = sphi %s1451_s7, %s26_s7   ;;  %s1382_s30 = sphi %s1449_s30, %s1763_s30   ;;  %s1378_s29 = sphi %s1447_s29, %s1770_s29   ;;  %s1374_s28 = sphi %s1445_s28, %s1761_s28   ;;  %s1370_s27 = sphi %s1443_s27, %s1769_s27   ;;  %s1366_s26 = sphi %s1441_s26, %s1760_s26   ;;  %s1362_s25 = sphi %s1439_s25, %s1768_s25   ;;  %s1358_s24 = sphi %s1437_s24, %s1767_s24   ;;  %s1354_s23 = sphi %s1435_s23, %s1766_s23   ;;  %s1350_s22 = sphi %s1433_s22, %s1765_s22   ;;  %s1346_s21 = sphi %s1431_s21, %s1764_s21  }
  0x14   : > { %1728 = sst [smem:[#allocation18_spill]] %s1366_s26  ;;  %p849_p0 = scmp.ge.s32.totalorder %s1386_s7, 1 }
  0x15   : > { %1729 = sst [smem:[#allocation19_spill]] %s1374_s28  ;;  %p59_p1 = scmp.eq.s32.totalorder %s1487_s8, 0 }
  0x16   : > { %1730 = sst [smem:[#allocation20_spill]] %s1382_s30  ;;  %p207_p2 = scmp.lt.s32.totalorder %s1386_s7, 5 }
  0x17   : > { %1731 = sst [smem:[#allocation21_spill]] %s1386_s7  ;;  %s1388_s13 = smov [#allocation8]  }
  0x18   : > { %s1732_s2 = sld [smem:[#allocation29_spill]]  ;;  %p1495_p3 = pnand %p849_p0, %p207_p2 }
  0x19   : > { %s220_s14 = sshll.u32 %s1388_s13, 4  ;;  %s1734_s3 = sld [smem:[#allocation30_spill]]  ;;  %s221_s14 = int_to_ptr.vmem [resolvable:$true] %s220_s14 }
  0x1a   : > { %p1006_p4 = pneg %p1495_p3  ;;  %s1389_s18 = smov 64  }
  0x1b   : > { %s1390_s19 = smov 4   ;;  %s1391_s20 = smov [#allocation9]  }
  0x1c   : > { %p1007_p5 = pnand %p1006_p4, %p59_p1  ;;  %s234_s9 = sshll.u32 %s1391_s20, 4  ;;  %s235_s9 = int_to_ptr.vmem [resolvable:$true] %s234_s9 }
  0x1d   : > { %s848_s10 = sadd.s32 4294967294, %s1386_s7   ;;  %s35_s13 = sadd.s32 1, %s1378_s29 }
  0x1e   : > { %s218_s11 = sshll.u32 %s1732_s2, 4  ;;  %p36_p6 = scmp.ge.s32.totalorder %s35_s13, 2  ;;  %s219_s11 = int_to_ptr.hbm [resolvable:$true] %s218_s11 }
  0x1f   : > { %s232_s17 = sshll.u32 %s1734_s3, 4  ;;  %p52_p7 = scmp.ne.s32.totalorder %s1366_s26, %s1362_s25  ;;  %s233_s17 = int_to_ptr.hbm [resolvable:$true] %s232_s17 }
  0x20   : > { %1009 = dma.hbm_to_vmem [thread:$0]  (!%p1007_p5), %s219_s11, 1024, %s221_s14, [#allocation7], %s1389_s18, %s1389_s18, %s1390_s19  }
  0x21   : > { %1012 = dma.hbm_to_vmem [thread:$0]  (!%p1007_p5), %s233_s17, 2048, %s235_s9, [#allocation10], %s1389_s18, %s1389_s18, %s1390_s19  }
  0x22   : > { %s38_s11 = sadd.s32 1, %s1382_s30  ;;  %s45_s14 = sadd.s32 1, %s1366_s26 }
  0x23   : > { %s1772_s13 = smov (%p36_p6, %s35_s13), 0  ;;  %s1774_s11 = smov (!%p36_p6, %s38_s11), %s1382_s30 }
  0x24   : > { %1735 = sst [smem:[#allocation22_spill]] %s1772_s13  ;;  %p53_p8 = scmp.eq.s32.totalorder %s1386_s7, 0 }
  0x25   : > { %p1710_p9 = scmp.ne.s32.totalorder %s1362_s25, %s1358_s24  ;;  %p40_p10 = scmp.ge.s32.totalorder %s1774_s11, 2 }
  0x26   : > { %s69_s15 = ssub.s32 %s1378_s29, %s1772_s13  ;;  %p1525_p11 = por %p53_p8, %p52_p7 }
  0x27   : > { %p1534_p12 = por %p59_p1, %p1710_p9  ;;  %s1776_s11 = smov (%p40_p10, %s1774_s11), 0 }
  0x28   : > { %1738 = sst [smem:[#allocation23_spill]] %s1776_s11  ;;  %s73_s18 = sadd.s32 1, %s1354_s23 }
  0x29   : > { %p80_p13 = scmp.ne.s32.totalorder %s1354_s23, %s1350_s22  ;;  %s42_s19 = ssub.s32 %s1382_s30, %s1776_s11 }
  0x2a   : > { %p86_p0 = scmp.ne.s32.totalorder %s1350_s22, %s1346_s21  ;;  %p43_p2 = scmp.eq.s32.totalorder %s42_s19, 0 }
  0x2b   : > { %s70_s20 = sor.u32 %s69_s15, %s42_s19  ;;  %p1549_p5 = por %p80_p13, %p53_p8 }
  0x2c   : > { %p71_p4 = scmp.eq.s32.totalorder %s70_s20, 0  ;;  %p1561_p6 = por %p86_p0, %p59_p1 }
  0x2d   : > { %s1554_s2 = scalar_select %p43_p2, %s1366_s26, %s45_s14  }
  0x2e   : > { %s1557_s3 = scalar_select %p71_p4, %s1354_s23, %s73_s18  }
  0x2f   : > { %1740 = sst [smem:[#allocation24_spill]] %s1554_s2  ;;  %p194_p10 = scmp.eq.s32.totalorder %s1487_s8, 3 }
  0x30   : > { %1741 = sst [smem:[#allocation25_spill]] %s1557_s3  ;;  %p200_p9 = scmp.eq.s32.totalorder %s848_s10, 3 }
  0x31   : > { %p1026_p8 = scmp.lt.s32.totalorder %s1386_s7, 4  ;;  %p1570_p13 = por %p194_p10, %p52_p7 }
  0x32   : > { %s254_s14 = sand.u32 1, %s1366_s26   ;;  %p1745_p2 = scmp.ne.s32.totalorder %s1362_s25, %s1358_s24 }
  0x33   : > { %s1743_s21 = scalar_select %p1570_p13, 1, 0 }
  0x34   : > { %p1578_p4 = por %p200_p9, %p1745_p2  ;;  %s853_s18 = sshll.u32 %s254_s14, 3 }
  0x35   : > { %1744 = sst [smem:[#allocation26_spill]] %s1743_s21  ;;  %s854_s19 = sshll.u32 %s1382_s30, 3 }
  0x36   : > { %s1746_s15 = scalar_select %p1578_p4, 1, 0 }
  0x37   : > { %s1748_s0 = sld [smem:[#allocation28_spill]]  ;;  %s258_s3 = scalar_lea.vmem [#allocation3], %s853_s18 }
  0x38   : > { %1747 = sst [smem:[#allocation27_spill]] %s1746_s15  ;;  %s266_s6 = sshll.u32 %s258_s3, 4  ;;  %s267_s6 = int_to_ptr.vmem [resolvable:$true] %s266_s6 }
  0x39   : > { %p1014_p7 = pnand %p1026_p8, %p1525_p11  ;;  %s967_s26 = sshll.u32 %s1382_s30, 4 }
  0x3a   : > { %p1595_p9 = pnand %p1026_p8, %p1549_p5  ;;  %s273_s24 = sand.u32 1, %s1386_s7  }
  0x3b   : > { %s255_s21 = scalar_lea.sflag [#allocation4], %s254_s14  ;;  %s275_s11 = sand.u32 1, %s1354_s23  }
  0x3c   : > { %s282_s18 = sadd.s32 %s1378_s29, %s967_s26  ;;  %s274_s28 = scalar_lea.sflag [#allocation7], %s273_s24 }
  0x3d   : > { %s262_s10 = scalar_lea.hbm %s1748_s0, %s854_s19  ;;  %s855_s19 = sshll.u32 %s275_s11, 6 }
  0x3e   : > { %s264_s2 = sshll.u32 %s262_s10, 4  ;;  %s858_s3 = sshll.u32 %s282_s18, 3  ;;  %s265_s2 = int_to_ptr.hbm [resolvable:$true] %s264_s2 }
  0x3f   : > { %1016 = dma.hbm_to_vmem [thread:$0]  (!%p1014_p7), %s265_s2, 128, %s267_s6, %s255_s21  }
  0x40   : > { %s284_s16 = scalar_lea.hbm %s1703_s1, %s858_s3  ;;  %s277_s0 = scalar_lea.vmem [#allocation6], %s855_s19 }
  0x41   : > { %s287_s30 = sshll.u32 %s277_s0, 4  ;;  %s285_s9 = sshll.u32 %s284_s16, 4  ;;  %s288_s30 = int_to_ptr.vmem [resolvable:$true] %s287_s30  ;;  %s286_s9 = int_to_ptr.hbm [resolvable:$true] %s285_s9 }
  0x42   : > { %s1392_s5 = smov 256   ;;  %s1393_s4 = smov 128  }
  0x43   : > { %s1394_s7 = smov 8   ;;  %299 = sbr.rel (%p1495_p3) target bundleno = 441 (0x1b9), region = 44 }
  0x44   : > { %1019 = dma.hbm_to_vmem [thread:$0]  (!%p1595_p9), %s286_s9, 1024, %s288_s30, %s274_s28, %s1392_s5, %s1393_s4, %s1394_s7  }
  0x45   : > { %s1610_s2 = sand.u32 (!%p1495_p3), 1, %s1362_s25  }
  0x46   : > { %s860_s6 = sshll.u32 (!%p1495_p3), %s1610_s2, 3  ;;  %s302_s0 = scalar_lea.sflag (!%p1495_p3), [#allocation4], %s1610_s2 }
  0x47   : > { %s1614_s26 = scalar_lea.vmem (!%p1495_p3), [#allocation3], %s860_s6 }
  0x48   : > { %1325 = dma.done.wait (%p1534_p12), %s302_s0, 128  }
  0x49   : > { %1327 = vsyncadd (%p1534_p12), %s302_s0, 4294967168  ;;  %s311_s4 = sand.u32 1, %s1487_s8   ;;  %s313_s5 = sand.u32 1, %s1350_s22  }
  0x4a   : > { %s861_s24 = sshll.u32 %s313_s5, 6  ;;  %s312_s28 = scalar_lea.sflag [#allocation7], %s311_s4 }
  0x4b   : > { %s315_s30 = scalar_lea.vmem [#allocation6], %s861_s24 }
  0x4c   : > { %1329 = dma.done.wait (%p1561_p6), %s312_s28, 1024  }
  0x4d   : > { %1331 = vsyncadd (%p1561_p6), %s312_s28, 4294966272 }
  0x4e   : > { %1333 = dma.done.wait (%p59_p1), [#allocation7], 1024  }
  0x4f   : > { %1335 = vsyncadd (%p59_p1), [#allocation7], 4294966272 }
  0x50   : > { %1337 = dma.done.wait (%p59_p1), [#allocation10], 2048  }
  0x51   : > { %1339 = vsyncadd (%p59_p1), [#allocation10], 4294965248  ;;  %s1634_s7 = scalar_lea.vmem [#allocation11], %s860_s6  ;;  %p865_p3 = scmp.ne.s32.totalorder %s1370_s27, 0 }
  0x53   : > { %364 = sbr.rel (%p865_p3) target bundleno = 90 (0x5a), region = 64 }
  0x58   : > { %v1395_v0 = vmov 0.0  }
  0x59   : > { %365 = vst [vmem:[#allocation2] sm:$0xff] %v1395_v0 }
  0x5a PF: > { %v367_v1 = vld [vmem:[%s315_s30] sm:$0xff]  ;;  %v368_v2 = vld [vmem:[%s315_s30 + $0x8] sm:$0xff]  ;;  %v369_v3 = vld [vmem:[%s315_s30 + $0x10] sm:$0xff]  ;;  %vm431_vm0 = vcmask 1041409   ;;  %vm433_vm1 = vcmask 1042434   ;;  %vm435_vm2 = vcmask 1043459  }
  0x5b   : > { %v370_v4 = vld [vmem:[%s315_s30 + $0x18] sm:$0xff]  ;;  %v371_v5 = vld [vmem:[%s315_s30 + $0x20] sm:$0xff]  ;;  %v375_v6 = vrot.slane %v367_v1, 4  ;;  %v381_v7 = vrot.slane %v368_v2, 4  ;;  %v372_v8 = vld [vmem:[%s315_s30 + $0x28] sm:$0xff]  ;;  %v387_v11 = vrot.slane %v369_v3, 4 }
  0x5c   : > { %v373_v9 = vld [vmem:[%s315_s30 + $0x30] sm:$0xff]  ;;  %v374_v10 = vld [vmem:[%s315_s30 + $0x38] sm:$0xff]  ;;  %v393_v12 = vrot.slane %v370_v4, 4  ;;  %v399_v13 = vrot.slane %v371_v5, 4  ;;  %v405_v16 = vrot.slane %v372_v8, 4  ;;  %vm437_vm3 = vcmask 1044484  }
  0x5d   : > { %v376_v14 = vadd.f32 %v375_v6, %v367_v1  ;;  %v382_v15 = vadd.f32 %v381_v7, %v368_v2  ;;  %v411_v17 = vrot.slane %v373_v9, 4  ;;  %v388_v18 = vadd.f32 %v387_v11, %v369_v3  ;;  %p866_p1 = scmp.ne.s32.totalorder %s1370_s27, 1 }
  0x5e   : > { %v394_v19 = vadd.f32 %v393_v12, %v370_v4  ;;  %v400_v20 = vadd.f32 %v399_v13, %v371_v5  ;;  %v417_v21 = vrot.slane %v374_v10, 4  ;;  %v406_v24 = vadd.f32 %v405_v16, %v372_v8  ;;  %s1750_s12 = sld [smem:[#allocation31_spill]] (!%p866_p1) }
  0x5f   : > { %v377_v22 = vrot.slane %v376_v14, 2  ;;  %v383_v23 = vrot.slane %v382_v15, 2  ;;  %v412_v25 = vadd.f32 %v411_v17, %v373_v9  ;;  %v389_v26 = vrot.slane %v388_v18, 2  ;;  %s1751_s21 = sld [smem:[#allocation32_spill]] (!%p866_p1) }
  0x60   : > { %v395_v27 = vrot.slane %v394_v19, 2  ;;  %v401_v28 = vrot.slane %v400_v20, 2  ;;  %v418_v29 = vadd.f32 %v417_v21, %v374_v10  ;;  %v407_v32 = vrot.slane %v406_v24, 2  ;;  %v366_v61 = vld [vmem:[#allocation2] sm:$0xff] }
  0x61   : > { %v378_v30 = vadd.f32 %v377_v22, %v376_v14  ;;  %v384_v31 = vadd.f32 %v383_v23, %v382_v15  ;;  %v413_v33 = vrot.slane %v412_v25, 2  ;;  %v390_v34 = vadd.f32 %v389_v26, %v388_v18 }
  0x62   : > { %v396_v35 = vadd.f32 %v395_v27, %v394_v19  ;;  %v402_v36 = vadd.f32 %v401_v28, %v400_v20  ;;  %v419_v37 = vrot.slane %v418_v29, 2  ;;  %v408_v40 = vadd.f32 %v407_v32, %v406_v24 }
  0x63   : > { %v379_v38 = vrot.slane %v378_v30, 1  ;;  %v385_v39 = vrot.slane %v384_v31, 1  ;;  %v414_v41 = vadd.f32 %v413_v33, %v412_v25  ;;  %v391_v42 = vrot.slane %v390_v34, 1 }
  0x64   : > { %v397_v43 = vrot.slane %v396_v35, 1  ;;  %v403_v44 = vrot.slane %v402_v36, 1  ;;  %v420_v45 = vadd.f32 %v419_v37, %v418_v29  ;;  %v409_v48 = vrot.slane %v408_v40, 1 }
  0x65   : > { %v380_v46 = vadd.f32 %v379_v38, %v378_v30  ;;  %v386_v47 = vadd.f32 %v385_v39, %v384_v31  ;;  %v415_v49 = vrot.slane %v414_v41, 1  ;;  %v392_v50 = vadd.f32 %v391_v42, %v390_v34 }
  0x66   : > { %v398_v51 = vadd.f32 %v397_v43, %v396_v35  ;;  %v404_v52 = vadd.f32 %v403_v44, %v402_v36  ;;  %v421_v53 = vrot.slane %v420_v45, 1  ;;  %v410_v54 = vadd.f32 %v409_v48, %v408_v40 }
  0x67   : > { %v432_v55 = vsel %vm431_vm0, %v386_v47, %v380_v46  ;;  %v416_v56 = vadd.f32 %v415_v49, %v414_v41  ;;  %vm439_vm4 = vcmask 1045509   ;;  %vm441_vm5 = vcmask 1046534  }
  0x68   : > { %v434_v57 = vsel %vm433_vm1, %v392_v50, %v432_v55  ;;  %v422_v58 = vadd.f32 %v421_v53, %v420_v45  ;;  %vm443_vm6 = vcmask 1047559  }
  0x69   : > { %v436_v59 = vsel %vm435_vm2, %v398_v51, %v434_v57 }
  0x6a   : > { %v438_v60 = vsel %vm437_vm3, %v404_v52, %v436_v59 }
  0x6b   : > { %v440_v62 = vsel %vm439_vm4, %v410_v54, %v438_v60 }
  0x6c   : > { %v442_v63 = vsel %vm441_vm5, %v416_v56, %v440_v62  ;;  %451 = sbr.rel (%p866_p1) target bundleno = 420 (0x1a4), region = 68 }
  0x6d   : > { %v444_v0 = vsel %vm443_vm6, %v422_v58, %v442_v63 }
  0x6e   : > { %v446_v1 = vadd.f32 %v444_v0, %v366_v61 }
  0x70   : > { %447 = vst [vmem:[#allocation2] sm:$0xff] %v446_v1 }
  0x71   : > { %v991_v2 = vld [vmem:[#allocation8 + $0x38] sm:$0xff]  ;;  %v990_v3 = vld [vmem:[#allocation8 + $0x30] sm:$0xff]  ;;  %v989_v8 = vld [vmem:[#allocation8 + $0x28] sm:$0xff] }
  0x72   : > { %683 = vmatpush.bf16.msra.mxu2 %v991_v2  ;;  %v975_v4 = vld [vmem:[#allocation9 + $0x38] sm:$0xff]  ;;  %v974_v6 = vld [vmem:[#allocation9 + $0x30] sm:$0xff]  ;;  %v973_v9 = vld [vmem:[#allocation9 + $0x28] sm:$0xff] }
  0x73   : > { %v983_v5 = vld [vmem:[#allocation9 + $0x78] sm:$0xff]  ;;  %589 = vmatpush.bf16.msra.mxu0 %v975_v4  ;;  %v982_v7 = vld [vmem:[#allocation9 + $0x70] sm:$0xff]  ;;  %v981_v10 = vld [vmem:[#allocation9 + $0x68] sm:$0xff] }
  0x74   : > { %602 = vmatpush.bf16.msra.mxu1 %v983_v5  ;;  %v988_v11 = vld [vmem:[#allocation8 + $0x20] sm:$0xff]  ;;  %v987_v14 = vld [vmem:[#allocation8 + $0x18] sm:$0xff]  ;;  %v986_v17 = vld [vmem:[#allocation8 + $0x10] sm:$0xff] }
  0x75   : > { %v972_v12 = vld [vmem:[#allocation9 + $0x20] sm:$0xff]  ;;  %v971_v15 = vld [vmem:[#allocation9 + $0x18] sm:$0xff]  ;;  %v970_v18 = vld [vmem:[#allocation9 + $0x10] sm:$0xff] }
  0x76   : > { %684 = vmatpush.bf16.msra.mxu2 %v990_v3  ;;  %v980_v13 = vld [vmem:[#allocation9 + $0x60] sm:$0xff]  ;;  %v979_v16 = vld [vmem:[#allocation9 + $0x58] sm:$0xff]  ;;  %v978_v19 = vld [vmem:[#allocation9 + $0x50] sm:$0xff] }
  0x77   : > { %590 = vmatpush.bf16.msra.mxu0 %v974_v6  ;;  %v985_v20 = vld [vmem:[#allocation8 + $0x8] sm:$0xff]  ;;  %v984_v23 = vld [vmem:[#allocation8] sm:$0xff]  ;;  %v452_v24 = vld [vmem:[%s1614_s26] sm:$0xff] }
  0x78   : > { %603 = vmatpush.bf16.msra.mxu1 %v982_v7  ;;  %v969_v21 = vld [vmem:[#allocation9 + $0x8] sm:$0xff]  ;;  %v455_v25 = vpack.c.bf16 %v452_v24, %v452_v24  ;;  %v968_v26 = vld [vmem:[#allocation9] sm:$0xff] }
  0x79   : > { %v977_v22 = vld [vmem:[#allocation9 + $0x48] sm:$0xff]  ;;  %v976_v27 = vld [vmem:[#allocation9 + $0x40] sm:$0xff] }
  0x7a   : > { %685 = vmatpush.bf16.msra.mxu2 %v989_v8  ;;  %v453_v28 = vld [vmem:[#allocation2] sm:$0xff] }
  0x7b   : > { %591 = vmatpush.bf16.msra.mxu0 %v973_v9  ;;  %v454_v29 = vmul.f32 0.0625, %v453_v28  ;;  %v1126_v31 = vld [vmem:[%s1750_s12] ss:$0 sm:$0xff] }
  0x7c   : > { %604 = vmatpush.bf16.msra.mxu1 %v981_v10  ;;  %v1127_v41 = vld [vmem:[%s1751_s21] ss:$0 sm:$0xff] }
  0x7d   : > { %v456_v30 = vpack.c.bf16 %v454_v29, %v454_v29 }
  0x7e   : > { %686 = vmatpush.bf16.msra.mxu2 %v988_v11 }
  0x7f   : > { %592 = vmatpush.bf16.msra.mxu0 %v972_v12 }
  0x80   : > { %605 = vmatpush.bf16.msra.mxu1 %v980_v13 }
  0x82   : > { %687 = vmatpush.bf16.msra.mxu2 %v987_v14 }
  0x83   : > { %593 = vmatpush.bf16.msra.mxu0 %v971_v15 }
  0x84   : > { %606 = vmatpush.bf16.msra.mxu1 %v979_v16 }
  0x86   : > { %688 = vmatpush.bf16.msra.mxu2 %v986_v17 }
  0x87   : > { %594 = vmatpush.bf16.msra.mxu0 %v970_v18 }
  0x88   : > { %607 = vmatpush.bf16.msra.mxu1 %v978_v19 }
  0x8a   : > { %689 = vmatpush.bf16.msra.mxu2 %v985_v20 }
  0x8b   : > { %595 = vmatpush.bf16.msra.mxu0 %v969_v21 }
  0x8c   : > { %608 = vmatpush.bf16.msra.mxu1 %v977_v22 }
  0x8e   : > { %690 = vmatpush.bf16.msra.mxu2 %v984_v23 }
  0x8f   : > { %596 = vmatpush.bf16.msra.mxu0 %v968_v26 }
  0x90   : > { %609 = vmatpush.bf16.msra.mxu1 %v976_v27 }
  0x91   : > { %691 = vmatmul.bf16.vlgmr.msra.gmra.mxu2 %v455_v25 }
  0x92   : > { %597 = vmatmul.bf16.vlgmr.msra.gmra.mxu0 %v455_v25 }
  0x93   : > { %610 = vmatmul.bf16.vlgmr.msra.gmra.mxu1 %v456_v30 }
 0x10f   : > { %v598_v32 = vpop.f32.mrf.mxu0 }
 0x110   : > { %v611_v39 = vpop.f32.mrf.mxu1  ;;  %v599_v44 = vadd.f32 %v1127_v41, %v598_v32 }
 0x112   : > { %v612_v45 = vadd.f32 %v611_v39, %v599_v44 }
 0x114   : > { %v692_v33 = vpop.f32.mrf.mxu2 }
 0x115   : > { %v693_v34 = vadd.f32 %v1126_v31, %v692_v33 }
 0x117   : > { %v696_v35 = vmul.f32 1.442695, %v693_v34  ;;  %v600_v36 = vpop.f32.mrf.mxu0 }
 0x118   : > { %v613_v40 = vpop.f32.mrf.mxu1 }
 0x119   : > { %1128 = vpow2.f32 %v696_v35 }
 0x11c   : > { %v694_v37 = vpop.f32.mrf.mxu2 }
 0x11f   : > { %v1129_v38 = vpop.eup %1128 }
 0x120   : > { %698 = vadd.xlane.f32.xlu0 %v1129_v38 }
 0x193   : > { %v699_v42 = vpop.xlane.xlu0 %698 }
 0x194   : > { %v700_v43 = vadd.f32 1e-10, %v699_v42 }
 0x196   : > { %1130 = vrcp.f32 %v700_v43 }
 0x19c   : > { %v1131_v46 = vpop.eup %1130 }
 0x19d   : > { %v702_v47 = vmul.f32 %v1131_v46, %v1129_v38 }
 0x19f   : > { %v703_v48 = vmul.f32 %v702_v47, %v612_v45 }
 0x1a1   : > { %v704_v49 = vadd.f32 %v703_v48, %v452_v24 }
 0x1a3   : > { %705 = vst [vmem:[%s1634_s7] sm:$0xff] %v704_v49 }
 0x1a4 PF: > { %s1752_s14 = sld [smem:[#allocation19_spill]]  ;;  %s719_s10 = sshll.u32 %s1634_s7, 4  ;;  %s720_s10 = int_to_ptr.vmem [resolvable:$true] %s719_s10 }
 0x1a5   : > { %s1754_s3 = sld [smem:[#allocation33_spill]]  ;;  %s707_s9 = scalar_lea.sflag [#allocation5], %s1610_s2 }
 0x1aa   : > { %s964_s11 = sshll.u32 %s1752_s14, 3 }
 0x1ab   : > { %s717_s20 = scalar_lea.hbm %s1754_s3, %s964_s11  ;;  %s1272_s5 = scalar_lea.hbm %s1754_s3, 16 }
 0x1ac   : > { %s721_s16 = sshll.u32 %s717_s20, 4  ;;  %s722_s16 = int_to_ptr.hbm [resolvable:$true] %s721_s16 }
 0x1ad   : > { %s1266_s6 = sshra.s32 %s722_s16, 4  ;;  %s1267_s6 = int_to_ptr.hbm [resolvable:$true] %s1266_s6 }
 0x1ae   : > { %s1268_s0 = scalar_lea.hbm %s1267_s6, 8  ;;  %p1273_p5 = scmp.lt.s32.totalorder %s1267_s6, %s1754_s3 }
 0x1af   : > { %p1269_p11 = scmp.ne.s32.totalorder %s1267_s6, %s1268_s0  ;;  %p1274_p6 = scmp.lt.s32.totalorder %s1272_s5, %s1268_s0 }
 0x1b1   : > { %p1270_p12 = pnand %p1269_p11, %p1570_p13  ;;  %p1275_p10 = por %p1274_p6, %p1273_p5 }
 0x1b3   : > { %p1271_p0 = pneg %p1270_p12 }
 0x1b5   : > { %p1276_p8 = pnand %p1275_p10, %p1271_p0 }
 0x1b7   : > { %1279 = shalt.err (!%p1276_p8)
}
 0x1b8   : > { %1004 = dma.vmem_to_hbm [thread:$0]  (%p1570_p13), %s720_s10, 128, %s722_s16, %s707_s9  }
 0x1b9 PF: > { %s1755_s2 = sld [smem:[#allocation21_spill]] }
 0x1ba   : > { %s1756_s30 = sld [smem:[#allocation17_spill]] }
 0x1bf   : > { %p1029_p2 = scmp.ge.s32.totalorder %s1755_s2, 2 }
 0x1c0   : > { %s733_s27 = sand.u32 1, %s1756_s30  }
 0x1c1   : > { %p1021_p7 = pnand %p1029_p2, %p1578_p4  ;;  %s734_s8 = scalar_lea.sflag [#allocation5], %s733_s27 }
 0x1c3   : > { %p1022_p9 = pneg %p1021_p7 }
 0x1c5   : > { %1341 = dma.done.wait (%p1022_p9), %s734_s8, 128  }
 0x1c6   : > { %1343 = vsyncadd (%p1022_p9), %s734_s8, 4294967168  ;;  %s26_s7 = sadd.s32 1, %s1755_s2   ;;  %s1758_s12 = sld [smem:[#allocation25_spill]] }
 0x1c7   : > { %p23_p3 = scmp.ge.s32.totalorder %s26_s7, 6   ;;  %s1759_s13 = sld [smem:[#allocation18_spill]] }
 0x1c8   : > { %s1760_s26 = sld [smem:[#allocation24_spill]]  ;;  %s1764_s21 = smov %s1350_s22 }
 0x1c9   : > { %s1761_s28 = sld [smem:[#allocation20_spill]]  ;;  %s1765_s22 = smov %s1354_s23 }
 0x1ca   : > { %s1762_s17 = sld [smem:[#allocation22_spill]]  ;;  %s1767_s24 = smov %s1362_s25 }
 0x1cb   : > { %s1763_s30 = sld [smem:[#allocation23_spill]]  ;;  %s1769_s27 = smov %s1378_s29 }
 0x1cc   : > { %s1766_s23 = smov %s1758_s12  ;;  %25 = sbr.rel (!%p23_p3) target bundleno = 19 (0x13), region = 118 }
 0x1cd   : > { %s1768_s25 = smov %s1759_s13 }
 0x1d0   : > { %s1770_s29 = smov %s1762_s17 }
 0x1d1   :  { %740 = vsyncpa [#allocation4], 1 }
 0x1d2   :  { %742 = vsyncpa [#allocation4 + $0x1], 1 }
 0x1d3   :  { %743 = vsyncpa [#allocation7], 1 }
 0x1d4   :  { %745 = vsyncpa [#allocation7 + $0x1], 1 }
 0x1d5   :  { %746 = vsyncpa [#allocation10], 1 }
 0x1d6   :  { %747 = vsyncpa [#allocation5], 1 }
 0x1d7   :  { %749 = vsyncpa [#allocation5 + $0x1], 1 }

</bundles_post_ra>
